<compile_context>
chip_gen: v5e
topology: v5e:2x2
jax: 0.10.0
libtpu: 0.0.40
codegen_flags: <defaults>
</compile_context>

<pallas_src>
import functools
import math

import jax
import jax.numpy as jnp
from jax.experimental import pallas as pl
from jax.experimental.pallas import tpu as pltpu

# eval-mode BatchNorm (running mean=0, var=1, gamma=1, beta=0) folds to a constant scale, baked
# into the conv weights at parameter-build time.
# TODO(synk): training-mode BatchNorm batch statistics are not reproduced (eval-mode stats used).
BNS = 1.0 / math.sqrt(1.0 + 1e-5)


def _device_cfg():
    kind = ""
    try:
        kind = jax.devices()[0].device_kind.lower().replace(" ", "")
    except Exception:
        pass
    is_v7 = ("v7" in kind) or ("tpu7" in kind)
    num_tc = 2 if is_v7 else 1                       # v7x: 2 TensorCores/chip; v5e/v6e: 1
    vmem = (48 if is_v7 else 96) * 1024 * 1024       # v7x has 64 MiB physical VMEM; others 128 MiB
    return num_tc, vmem


NUM_TC, VMEM_LIMIT = _device_cfg()


def _round_up(x, m):
    return (x + m - 1) // m * m


def _flat2(x):
    return x.reshape(-1, x.shape[-1])


# ----------------------------- matmul geometry & weight packing ------------------------

def _geom_k(K):
    """Single full-extent K tile whenever it fits (no K padding of activations); else pad + tile."""
    if K <= 4096:
        return K, K, 1
    tk = 2048
    Kp = _round_up(K, tk)
    return Kp, tk, Kp // tk


def _geom_n(N):
    """Single full-extent N tile (natural output width, contiguous row DMAs); else pad + tile."""
    if N <= 1024:
        return N, N, 1
    tn = 512
    Np = _round_up(N, tn)
    return Np, tn, Np // tn


def _geom_m(M):
    Mp = _round_up(M, 16)                            # bf16 sublane packing
    if Mp <= 1024:
        if NUM_TC >= 2 and Mp >= 256:
            tm = _round_up((Mp + NUM_TC - 1) // NUM_TC, 16)   # give every TensorCore a block
        else:
            tm = Mp                                  # single block on single-TC chips
    else:
        tm = 512
        for cand in (512, 384, 256, 128):
            if Mp % cand == 0:
                tm = cand
                break
    Mp = _round_up(Mp, tm)
    return Mp, tm


def pack_dense(w2d, bias=None, alpha=None):
    """Pre-pad (only if multi-tile) + pre-cast a (K, N) weight (and bias / PReLU alpha) once."""
    K, N = w2d.shape
    Kp, _, _ = _geom_k(K)
    Np, _, _ = _geom_n(N)
    w = w2d.astype(jnp.float32)
    if (Kp, Np) != (K, N):
        w = jnp.pad(w, ((0, Kp - K), (0, Np - N)))
    pk = {'w': w.astype(jnp.bfloat16), 'K': K, 'N': N}
    if bias is not None:
        pk['b'] = jnp.pad(bias.astype(jnp.float32), (0, Np - N)).reshape(1, Np)
    if alpha is not None:
        pk['alpha'] = jnp.pad(alpha.astype(jnp.float32), (0, Np - N)).reshape(1, Np)
    return pk


# ----------------------------- fused matmul kernel --------------------------------------

def _mm_kernel(*refs, nk, act, has_pre, has_bias, has_alpha, has_add, has_res, res_scale):
    idx = 0
    a_ref = refs[idx]; idx += 1
    pre_ref = refs[idx] if has_pre else None; idx += int(has_pre)
    w_ref = refs[idx]; idx += 1
    b_ref = refs[idx] if has_bias else None; idx += int(has_bias)
    al_ref = refs[idx] if has_alpha else None; idx += int(has_alpha)
    add_ref = refs[idx] if has_add else None; idx += int(has_add)
    res_ref = refs[idx] if has_res else None; idx += int(has_res)
    o_ref = refs[idx]; idx += 1
    acc_ref = refs[idx] if nk > 1 else None

    a = a_ref[...]
    if has_pre:
        a = a + pre_ref[...]
    part = jnp.dot(a, w_ref[...], preferred_element_type=jnp.float32)

    def epilogue(r):
        if has_bias:
            r = r + b_ref[...]
        if has_add:
            r = r + add_ref[...].astype(jnp.float32)
        if act == 'relu':
            r = jnp.maximum(r, 0.0)
        elif act == 'lrelu':
            r = jnp.where(r >= 0, r, 0.2 * r)
        elif act == 'sigmoid':
            r = jax.nn.sigmoid(r)
        elif act == 'prelu':
            r = jnp.where(r >= 0, r, al_ref[...] * r)
        if has_res:
            rr = res_ref[...].astype(jnp.float32)
            r = r + (rr if res_scale == 1.0 else res_scale * rr)
        return r

    if nk == 1:
        o_ref[...] = epilogue(part).astype(o_ref.dtype)
    else:
        k = pl.program_id(2)

        @pl.when(k == 0)
        def _():
            acc_ref[...] = part

        @pl.when(k > 0)
        def _():
            acc_ref[...] += part

        @pl.when(k == nk - 1)
        def _():
            o_ref[...] = epilogue(acc_ref[...]).astype(o_ref.dtype)


def matmul_fused(a, pack, act='none', add=None, res=None, res_scale=1.0, pre_add=None):
    """out = act((a [+ pre_add]) @ w [+ bias] [+ add]) [+ res_scale * res]; bf16 in/out, f32 acc."""
    M, K = a.shape
    N = pack['N']
    assert K == pack['K'], (K, pack['K'])
    Kp, tk, nk = _geom_k(K)
    Np, tn, nj = _geom_n(N)
    Mp, tm = _geom_m(M)
    assert pack['w'].shape == (Kp, Np), (pack['w'].shape, Kp, Np)

    def _prep_a(t):
        t = t.astype(jnp.bfloat16)
        if (Mp, Kp) != (M, K):
            t = jnp.pad(t, ((0, Mp - M), (0, Kp - K)))
        return t

    operands = [_prep_a(a)]
    in_specs = [pl.BlockSpec((tm, tk), lambda i, j, k: (i, k))]
    has_pre = pre_add is not None
    if has_pre:
        operands.append(_prep_a(pre_add))
        in_specs.append(pl.BlockSpec((tm, tk), lambda i, j, k: (i, k)))

    operands.append(pack['w'])
    in_specs.append(pl.BlockSpec((tk, tn), lambda i, j, k: (k, j)))

    has_bias = 'b' in pack
    if has_bias:
        operands.append(pack['b'])
        in_specs.append(pl.BlockSpec((1, tn), lambda i, j, k: (0, j)))
    has_alpha = act == 'prelu'
    if has_alpha:
        operands.append(pack['alpha'])
        in_specs.append(pl.BlockSpec((1, tn), lambda i, j, k: (0, j)))

    def _prep_mn(t):
        assert t.shape == (M, N), (t.shape, M, N)
        t = t.astype(jnp.bfloat16)
        if nj > 1:                        # rare fallback: operand must match the padded/tiled output
            t = jnp.pad(t, ((0, Mp - M), (0, Np - N)))
            return t, pl.BlockSpec((tm, tn), lambda i, j, k: (i, j))
        if Mp != M:
            t = jnp.pad(t, ((0, Mp - M), (0, 0)))
        return t, pl.BlockSpec((tm, N), lambda i, j, k: (i, 0))

    has_add = add is not None
    if has_add:
        t, spec = _prep_mn(add)
        operands.append(t)
        in_specs.append(spec)
    has_res = res is not None
    if has_res:
        t, spec = _prep_mn(res)
        operands.append(t)
        in_specs.append(spec)

    scratch = [pltpu.VMEM((tm, tn), jnp.float32)] if nk > 1 else []
    cost = pl.CostEstimate(
        flops=2 * Mp * Kp * Np,
        transcendentals=Mp * Np if act == 'sigmoid' else 0,
        bytes_accessed=2 * (Mp * Kp * (1 + int(has_pre)) + Kp * Np
                            + Mp * Np * (1 + int(has_add) + int(has_res))))

    out = pl.pallas_call(
        functools.partial(_mm_kernel, nk=nk, act=act, has_pre=has_pre, has_bias=has_bias,
                          has_alpha=has_alpha, has_add=has_add, has_res=has_res,
                          res_scale=res_scale),
        out_shape=jax.ShapeDtypeStruct((Mp, Np), jnp.bfloat16),
        grid_spec=pltpu.PrefetchScalarGridSpec(
            num_scalar_prefetch=0,
            grid=(Mp // tm, nj, nk),
            in_specs=in_specs,
            out_specs=pl.BlockSpec((tm, tn), lambda i, j, k: (i, j)),
            scratch_shapes=scratch),
        compiler_params=pltpu.CompilerParams(
            dimension_semantics=("parallel", "parallel", "arbitrary"),
            vmem_limit_bytes=VMEM_LIMIT),
        cost_estimate=cost,
    )(*operands)
    if (Mp, Np) != (M, N):
        out = out[:M, :N]
    return out


# ----------------------------- conv helpers (bf16 im2col + fused matmul) ----------------

def conv2d(x, cp, stride=1, padding=0, act='none', add=None, res=None, res_scale=1.0):
    """x NHWC; cp from make_conv (pre-packed weight). Zero padding; everything else fused."""
    kh, kw = cp['kh'], cp['kw']
    xb = x.astype(jnp.bfloat16)
    if padding > 0:
        xb = jnp.pad(xb, ((0, 0), (padding, padding), (padding, padding), (0, 0)))
    B, H, W, C = xb.shape
    Ho = (H - kh) // stride + 1
    Wo = (W - kw) // stride + 1
    if kh == 1 and kw == 1 and stride == 1:
        patches = xb.reshape(B * H * W, C)
    else:
        # TODO(synk): fold the taps into the matmul K grid to avoid this (bf16) HBM intermediate.
        cols = [xb[:, i:i + (Ho - 1) * stride + 1:stride, j:j + (Wo - 1) * stride + 1:stride, :]
                for i in range(kh) for j in range(kw)]
        patches = jnp.concatenate(cols, axis=-1).reshape(B * Ho * Wo, kh * kw * C)
    out = matmul_fused(patches, cp['pack'], act=act, add=add, res=res, res_scale=res_scale)
    return out.reshape(B, Ho, Wo, cp['pack']['N'])


# ----------------------------- small fused elementwise / pooling kernels ----------------

def _spatial_tile(HW, per_pos_bytes, budget=(2 << 20)):
    """Pick a spatial tile that divides HW, keeps blocks under ~2 MiB and stays 8-aligned."""
    t = HW
    while t % 2 == 0 and t // 2 >= 8 and t * per_pos_bytes > budget:
        t //= 2
    if t != HW and t % 8 != 0:
        t = HW
    return t


def _ew_add_kernel(a_ref, b_ref, o_ref):
    o_ref[...] = a_ref[...] + b_ref[...]


def ew_add(a, b):
    """Lane-dense tiled elementwise add (only used where the add cannot be fused upstream)."""
    shape = a.shape
    size = a.size
    if size % 128 == 0:
        a2, b2 = a.reshape(size // 128, 128), b.reshape(size // 128, 128)
    else:
        a2, b2 = a.reshape(1, size), b.reshape(1, size)
    rows, cols = a2.shape
    rb = rows if rows <= 2048 else 2048
    rows_p = _round_up(rows, rb)
    if rows_p != rows:
        a2 = jnp.pad(a2, ((0, rows_p - rows), (0, 0)))
        b2 = jnp.pad(b2, ((0, rows_p - rows), (0, 0)))
    out = pl.pallas_call(
        _ew_add_kernel,
        out_shape=jax.ShapeDtypeStruct((rows_p, cols), jnp.float32),
        grid=(rows_p // rb,),
        in_specs=[pl.BlockSpec((rb, cols), lambda i: (i, 0))] * 2,
        out_specs=pl.BlockSpec((rb, cols), lambda i: (i, 0)),
        compiler_params=pltpu.CompilerParams(vmem_limit_bytes=VMEM_LIMIT),
    )(a2.astype(jnp.float32), b2.astype(jnp.float32))
    if rows_p != rows:
        out = out[:rows]
    return out.reshape(shape)


def _ca_gate_kernel(x_ref, w1_ref, b1_ref, w2_ref, b2_ref, g_ref, acc_ref, *, nblk, inv_hw):
    k = pl.program_id(0)
    part = jnp.sum(x_ref[...].astype(jnp.float32), axis=1)                         # (B, C)

    @pl.when(k == 0)
    def _():
        acc_ref[...] = part

    @pl.when(k > 0)
    def _():
        acc_ref[...] += part

    @pl.when(k == nblk - 1)
    def _():
        pooled = acc_ref[...] * inv_hw
        h1 = jnp.sum(pooled[:, :, None] * w1_ref[...][None, :, :], axis=1) + b1_ref[...]
        h1 = jnp.maximum(h1, 0.0)                                                  # (B, Cr)
        h2 = jnp.sum(h1[:, :, None] * w2_ref[...][None, :, :], axis=1) + b2_ref[...]
        g_ref[...] = jax.nn.sigmoid(h2)                                            # (B, C)


def ca_gate(p, r):
    """Channel attention squeeze: tiled global average pool + FC-ReLU-FC-sigmoid in one kernel."""
    B, H, W, C = r.shape
    HW = H * W
    thw = _spatial_tile(HW, B * C * 2)
    nblk = HW // thw
    cr = p['w1'].shape[1]
    return pl.pallas_call(
        functools.partial(_ca_gate_kernel, nblk=nblk, inv_hw=1.0 / HW),
        out_shape=jax.ShapeDtypeStruct((B, C), jnp.float32),
        grid=(nblk,),
        in_specs=[pl.BlockSpec((B, thw, C), lambda i: (0, i, 0)),
                  pl.BlockSpec((C, cr), lambda i: (0, 0)),
                  pl.BlockSpec((1, cr), lambda i: (0, 0)),
                  pl.BlockSpec((cr, C), lambda i: (0, 0)),
                  pl.BlockSpec((1, C), lambda i: (0, 0))],
        out_specs=pl.BlockSpec((B, C), lambda i: (0, 0)),
        scratch_shapes=[pltpu.VMEM((B, C), jnp.float32)],
        compiler_params=pltpu.CompilerParams(dimension_semantics=("arbitrary",),
                                             vmem_limit_bytes=VMEM_LIMIT),
    )(r.reshape(B, HW, C).astype(jnp.bfloat16), p['w1'], p['b1'], p['w2'], p['b2'])


def _ca_apply_kernel(r_ref, g_ref, x_ref, o_ref):
    o_ref[...] = (r_ref[...].astype(jnp.float32) * g_ref[...][:, None, :]
                  + x_ref[...].astype(jnp.float32)).astype(o_ref.dtype)


def ca_apply(r, g, x):
    """out = r * channel-gate (broadcast over space) + residual x, tiled over the spatial axis."""
    B, H, W, C = r.shape
    HW = H * W
    thw = _spatial_tile(HW, B * C * 2 * 3)
    nblk = HW // thw
    out = pl.pallas_call(
        _ca_apply_kernel,
        out_shape=jax.ShapeDtypeStruct((B, HW, C), jnp.bfloat16),
        grid=(nblk,),
        in_specs=[pl.BlockSpec((B, thw, C), lambda i: (0, i, 0)),
                  pl.BlockSpec((B, C), lambda i: (0, 0)),
                  pl.BlockSpec((B, thw, C), lambda i: (0, i, 0))],
        out_specs=pl.BlockSpec((B, thw, C), lambda i: (0, i, 0)),
        compiler_params=pltpu.CompilerParams(dimension_semantics=("parallel",),
                                             vmem_limit_bytes=VMEM_LIMIT),
    )(r.reshape(B, HW, C).astype(jnp.bfloat16), g, x.reshape(B, HW, C).astype(jnp.bfloat16))
    return out.reshape(B, H, W, C)


def _suft_pool_kernel(d_ref, r_ref, g_ref, o_ref, *, s, inv):
    d = d_ref[...].astype(jnp.float32)            # (tb, s, w, s, C1)
    r = r_ref[...].astype(jnp.float32)            # (tb, s, w, s, C2)
    g = g_ref[...].astype(jnp.float32)
    acc_d = None
    acc_r = None
    for i in range(s):
        for j in range(s):
            dd = d[:, i, :, j, :]
            rr = r[:, i, :, j, :] * g[:, i, :, j, :]
            acc_d = dd if acc_d is None else acc_d + dd
            acc_r = rr if acc_r is None else acc_r + rr
    o_ref[...] = (jnp.concatenate([acc_d, acc_r], axis=-1) * inv).astype(o_ref.dtype)


def suft_pool(dp_h, rgb, gate, s):
    """Fused: gate-multiply the RGB features, s*s window-mean both streams, concat channels."""
    B, H, W, C1 = dp_h.shape
    C2 = rgb.shape[-1]
    h, w = H // s, W // s
    BH = B * h
    d5 = dp_h.astype(jnp.bfloat16).reshape(BH, s, w, s, C1)
    r5 = rgb.astype(jnp.bfloat16).reshape(BH, s, w, s, C2)
    g5 = gate.astype(jnp.bfloat16).reshape(BH, s, w, s, C2)
    per_row = s * w * s * (C1 + 2 * C2) * 2 + w * (C1 + C2) * 2
    tb = BH
    while tb % 2 == 0 and tb > 1 and tb * per_row > (2 << 20):
        tb //= 2
    nblk = BH // tb
    out = pl.pallas_call(
        functools.partial(_suft_pool_kernel, s=s, inv=1.0 / (s * s)),
        out_shape=jax.ShapeDtypeStruct((BH, w, C1 + C2), jnp.bfloat16),
        grid=(nblk,),
        in_specs=[pl.BlockSpec((tb, s, w, s, C1), lambda i: (i, 0, 0, 0, 0)),
                  pl.BlockSpec((tb, s, w, s, C2), lambda i: (i, 0, 0, 0, 0)),
                  pl.BlockSpec((tb, s, w, s, C2), lambda i: (i, 0, 0, 0, 0))],
        out_specs=pl.BlockSpec((tb, w, C1 + C2), lambda i: (i, 0, 0)),
        compiler_params=pltpu.CompilerParams(dimension_semantics=("parallel",),
                                             vmem_limit_bytes=VMEM_LIMIT),
    )(d5, r5, g5)
    return out.reshape(B, h, w, C1 + C2)


# ----------------------------- parameter construction -----------------------------------

class ParamGen:
    def __init__(self, seed=0):
        self.key = jax.random.PRNGKey(seed)
        self.n = 0

    def normal(self, shape):
        self.n += 1
        return jax.random.normal(jax.random.fold_in(self.key, self.n), shape, jnp.float32)


def make_conv(pg, cin, cout, k, bias=True, w_scale=1.0, prelu=False):
    w = pg.normal((k, k, cin, cout)) * (w_scale / math.sqrt(k * k * cin))
    b = pg.normal((cout,)) * 0.01 if bias else None
    al = jnp.full((cout,), 0.25, jnp.float32) if prelu else None
    return {'kh': k, 'kw': k, 'pack': pack_dense(w.reshape(k * k * cin, cout), b, al)}


# --------- RCAN pieces: CALayer / RCAB / ResidualGroup ---------

def make_ca(pg, c, red=16):
    cr = max(c // red, 1)
    return {'w1': pg.normal((c, cr)) / math.sqrt(c), 'b1': jnp.zeros((1, cr), jnp.float32),
            'w2': pg.normal((cr, c)) / math.sqrt(cr), 'b2': jnp.zeros((1, c), jnp.float32)}


def make_rcab(pg, c, k):
    return {'c1': make_conv(pg, c, c, k), 'c2': make_conv(pg, c, c, k), 'ca': make_ca(pg, c)}


def rcab(p, x, k):
    r = conv2d(x, p['c1'], padding=k // 2, act='relu')
    r = conv2d(r, p['c2'], padding=k // 2)
    g = ca_gate(p['ca'], r)
    return ca_apply(r, g, x)          # r * gate + residual, fused


def make_rg(pg, c, k, n):
    return {'blocks': [make_rcab(pg, c, k) for _ in range(n)], 'tail': make_conv(pg, c, c, k)}


def residual_group(p, x, k):
    r = x
    for bp in p['blocks']:
        r = rcab(bp, r, k)
    return conv2d(r, p['tail'], padding=k // 2, res=_flat2(x))   # residual fused into tail conv


# --------- FFC pieces: FourierUnit / SpectralTransform / FFC_BN_ACT / FFCResnetBlock ---------

def make_fu(pg, c):
    # TODO(synk): checkpoint porting would need a channel permutation (PyTorch interleaves re/im).
    return {'w': pack_dense(pg.normal((2 * c, 2 * c)) * (BNS / math.sqrt(2 * c)))}


def fourier_unit(p, x):
    # TODO(synk): rfft2/irfft2 have no Pallas primitive; FFT stays in jnp.fft, the 1x1 conv is Pallas.
    B, H, W, C = x.shape
    X = jnp.fft.rfft2(x.astype(jnp.float32), axes=(1, 2), norm='ortho')
    Wf = X.shape[2]
    feat = jnp.concatenate([X.real, X.imag], axis=-1).reshape(B * H * Wf, 2 * C)
    y = matmul_fused(feat, p['w'], act='relu').reshape(B, H, Wf, 2 * C).astype(jnp.float32)
    return jnp.fft.irfft2(y[..., :C] + 1j * y[..., C:], s=(H, W), axes=(1, 2), norm='ortho')


def make_st(pg, cin, cout):
    ch = cout // 2
    return {'c1': pack_dense(pg.normal((cin, ch)) * (BNS / math.sqrt(cin))),
            'fu': make_fu(pg, ch),
            'c2': pack_dense(pg.normal((ch, cout)) * (BNS / math.sqrt(ch)))}   # outer BN folded


def spectral_transform(p, x, act='none', res=None):
    B, H, W, C = x.shape
    ch = p['c1']['N']
    x1 = matmul_fused(_flat2(x), p['c1'], act='relu')                 # (M, ch) bf16
    fu = fourier_unit(p['fu'], x1.reshape(B, H, W, ch))               # (B, H, W, ch)
    # (x1 + fu) @ c2 with the add fused pre-matmul (no HBM intermediate for the sum).
    out = matmul_fused(x1, p['c2'], act=act, res=res, pre_add=_flat2(fu))
    return out.reshape(B, H, W, p['c2']['N'])


def make_ffc(pg, cin, cout, k, rin, rout):
    in_cg, out_cg = int(cin * rin), int(cout * rout)
    in_cl, out_cl = cin - in_cg, cout - out_cg
    p = {'cfg': (in_cl, in_cg, out_cl, out_cg, k)}
    # The BN scale after each branch sum is linear -> folded into every branch's weights.
    if in_cl and out_cl:
        p['l2l'] = make_conv(pg, in_cl, out_cl, k, bias=False, w_scale=BNS)
    if in_cl and out_cg:
        p['l2g'] = make_conv(pg, in_cl, out_cg, k, bias=False, w_scale=BNS)
    if in_cg and out_cl:
        p['g2l'] = make_conv(pg, in_cg, out_cl, k, bias=False, w_scale=BNS)
    if in_cg and out_cg:
        p['g2g'] = make_st(pg, in_cg, out_cg)
    return p


def ffc_bn_act(p, x_l, x_g, act='relu', res_l=None, res_g=None):
    """FFC branch sums + folded BN + act; optional post-act residuals fused into the last matmul."""
    in_cl, in_cg, out_cl, out_cg, k = p['cfg']
    pad = k // 2
    y_l = y_g = None
    if out_cl:
        if in_cl and in_cg:
            t = conv2d(x_g, p['g2l'], padding=pad)
            y_l = conv2d(x_l, p['l2l'], padding=pad, act=act, add=_flat2(t), res=res_l)
        elif in_cl:
            y_l = conv2d(x_l, p['l2l'], padding=pad, act=act, res=res_l)
        else:
            y_l = conv2d(x_g, p['g2l'], padding=pad, act=act, res=res_l)
    if out_cg:
        if in_cl and in_cg:
            t = spectral_transform(p['g2g'], x_g)
            y_g = conv2d(x_l, p['l2g'], padding=pad, act=act, add=_flat2(t), res=res_g)
        elif in_cl:
            y_g = conv2d(x_l, p['l2g'], padding=pad, act=act, res=res_g)
        else:
            y_g = spectral_transform(p['g2g'], x_g, act=act, res=res_g)
    return y_l, y_g


def make_ffc_resblock(pg, dim, r=0.75):
    return {'conv1': make_ffc(pg, dim, dim, 3, r, r),
            'conv2': make_ffc(pg, dim, dim, 3, r, r)}


def ffc_resnet_block(p, x_l, x_g):
    id_l, id_g = x_l, x_g
    x_l, x_g = ffc_bn_act(p['conv1'], x_l, x_g, act='relu')
    x_l, x_g = ffc_bn_act(p['conv2'], x_l, x_g, act='relu',
                          res_l=_flat2(id_l), res_g=_flat2(id_g))
    return x_l, x_g


# --------- DBPN DenseProjection (sub-pixel transposed conv) and SUFT bridge ---------

_PROJ_CFG = {2: (6, 2, 2), 4: (8, 4, 2), 8: (12, 8, 2)}


def _phase_meta(k, s, p):
    """Sub-pixel decomposition metadata of ConvTranspose(kernel=k, stride=s, padding=p)."""
    q = k - 1 - p
    metas = []
    for a in range(s):
        t0 = (q - a) % s
        m = (k - 1 - t0) // s + 1
        d = (a + t0 - q) // s
        padl, padr = -d, m - 1 + d
        assert padl >= 0 and padr >= 0
        metas.append((t0, m, padl, padr))
    return metas


def make_deconv(pg, cin, cout, k, s, p):
    # TODO(synk): weights are in forward-conv (zero-insertion) layout; porting trained PyTorch
    #             ConvTranspose2d weights would need a 180-degree spatial flip + cin/cout swap.
    w = pg.normal((k, k, cin, cout)) / math.sqrt(k * k * cin)
    b = pg.normal((cout,)) * 0.01
    alpha = jnp.full((cout,), 0.25, jnp.float32)
    metas = _phase_meta(k, s, p)
    uniform = all(m[1:] == metas[0][1:] for m in metas)
    dc = {'s': s, 'cout': cout, 'uniform': uniform}
    if uniform:  # scale 2: all phases share one im2col -> single packed matmul
        _, msub, padl, padr = metas[0]
        cols = []
        for a in range(s):
            for bb in range(s):
                sub = w[metas[a][0]::s, metas[bb][0]::s, :, :]      # (msub, msub, cin, cout)
                cols.append(sub.reshape(msub * msub * cin, cout))
        dc.update(ksub=msub, pad=(padl, padr),
                  pack=pack_dense(jnp.concatenate(cols, axis=1),
                                  jnp.tile(b, s * s), jnp.tile(alpha, s * s)))
    else:
        phases = []
        for a in range(s):
            row = []
            t0a, ma, pla, pra = metas[a]
            for bb in range(s):
                t0b, mb, plb, prb = metas[bb]
                sub = w[t0a::s, t0b::s, :, :].reshape(ma * mb * cin, cout)
                row.append({'pack': pack_dense(sub, b, alpha),
                            'ma': ma, 'mb': mb, 'pads': (pla, pra, plb, prb)})
            phases.append(row)
        dc['phases'] = phases
    return dc


def pixel_shuffle(packed, B, h, w, s, cout):
    y = packed.reshape(B, h, w, s, s, cout)
    y = jnp.transpose(y, (0, 1, 3, 2, 4, 5))
    return y.reshape(B, h * s, w * s, cout)


def deconv_apply(dc, x, act='prelu', res_packed=None):
    """ConvTranspose2d via sub-pixel phase decomposition (no zero-insertion / zero MACs)."""
    B, h, w, cin = x.shape
    s, cout = dc['s'], dc['cout']
    if dc['uniform']:
        msub = dc['ksub']
        padl, padr = dc['pad']
        xb = jnp.pad(x.astype(jnp.bfloat16), ((0, 0), (padl, padr), (padl, padr), (0, 0)))
        cols = [xb[:, i:i + h, j:j + w, :] for i in range(msub) for j in range(msub)]
        patches = jnp.concatenate(cols, axis=-1).reshape(B * h * w, msub * msub * cin)
        return matmul_fused(patches, dc['pack'], act=act, res=res_packed)  # (B*h*w, s*s*cout)
    out = jnp.zeros((B, h * s, w * s, cout), jnp.float32)
    for a in range(s):
        for bb in range(s):
            ph = dc['phases'][a][bb]
            pla, pra, plb, prb = ph['pads']
            xb = jnp.pad(x.astype(jnp.bfloat16), ((0, 0), (pla, pra), (plb, prb), (0, 0)))
            cols = [xb[:, i:i + h, j:j + w, :] for i in range(ph['ma']) for j in range(ph['mb'])]
            patches = jnp.concatenate(cols, axis=-1).reshape(B * h * w, ph['ma'] * ph['mb'] * cin)
            o = matmul_fused(patches, ph['pack'], act=act).reshape(B, h, w, cout)
            out = out.at[:, a::s, bb::s, :].set(o.astype(jnp.float32))
    return out


def make_dense_proj(pg, cin, nr, scale):
    k, s, pd = _PROJ_CFG[scale]
    return {'s': s, 'pad_down': pd,
            'dc1': make_deconv(pg, cin, nr, k, s, pd),
            'c2': make_conv(pg, nr, cin, k, prelu=True),
            'dc3': make_deconv(pg, cin, nr, k, s, pd)}


def dense_projection(p, x):
    """DBPN up-projection: a0 = up(x); e = down(a0) - x; out = a0 + up(e) (adds fused)."""
    B, h, w, cin = x.shape
    s = p['s']
    nr = p['dc1']['cout']
    a0_raw = deconv_apply(p['dc1'], x, act='prelu')
    uniform = p['dc1']['uniform'] and p['dc3']['uniform']
    a0 = pixel_shuffle(a0_raw, B, h, w, s, nr) if p['dc1']['uniform'] else a0_raw
    e = conv2d(a0, p['c2'], stride=s, padding=p['pad_down'], act='prelu',
               res=_flat2(x), res_scale=-1.0)                    # prelu(down(a0)) - x, fused
    a1_raw = deconv_apply(p['dc3'], e, act='prelu',
                          res_packed=a0_raw if uniform else None)
    if p['dc3']['uniform']:
        out = pixel_shuffle(a1_raw, B, h, w, s, nr)
        if not uniform:
            out = ew_add(out, a0)
    else:
        out = ew_add(a1_raw, a0)
    return out


def make_suft(pg, dp_feats, add_feats, scale):
    gw = pg.normal((dp_feats + add_feats, add_feats)) / math.sqrt(dp_feats + add_feats)
    return {'up': make_dense_proj(pg, dp_feats, dp_feats, scale),
            'gate': pack_dense(gw, jnp.zeros((add_feats,), jnp.float32)),
            'scale': scale}


def suft(p, dp, rgb):
    # TODO(synk): exact SUFT symmetric-uncertainty weighting unavailable; approximated by a learned
    #             sigmoid gate on concat(up(depth), rgb); up-projection, gating and pooling kept.
    dp_h = dense_projection(p['up'], dp)                              # (B, H, W, dp_feats)
    B, H, W, C1 = dp_h.shape
    C2 = rgb.shape[-1]
    cat = jnp.concatenate([dp_h.astype(jnp.bfloat16), rgb.astype(jnp.bfloat16)], axis=-1)
    g = matmul_fused(cat.reshape(-1, C1 + C2), p['gate'], act='sigmoid').reshape(B, H, W, C2)
    return suft_pool(dp_h, rgb, g, p['scale'])                        # (B, h, w, dp+add feats)


# ----------------------------- full FFDG network ---------------------------------------

def make_params(seed, F, K, scale):
    pg = ParamGen(seed)
    p = {}
    # conv_rgb1: ReflectionPad2d(3) + FFC(3->F, k7, all-local) + BN(folded) + ReLU
    p['conv_rgb1'] = make_conv(pg, 3, F, 7, bias=False, w_scale=BNS)
    p['rgb_conv1'] = make_ffc(pg, F, F, 3, 0.0, 0.75)
    p['rgb_rb1'] = make_ffc_resblock(pg, F)
    p['rgb_rb12'] = make_ffc_resblock(pg, F)
    p['rgb_rb13'] = make_ffc_resblock(pg, F)
    p['conv_dp1'] = make_conv(pg, 1, F, K)
    p['dp_rg1'] = make_rg(pg, F, K, 4)
    p['dp_rg2'] = make_rg(pg, 2 * F, K, 4)
    p['dp_rg3'] = make_rg(pg, 3 * F, K, 4)
    p['dp_rg4'] = make_rg(pg, 4 * F, K, 4)
    p['bridge1'] = make_suft(pg, F, F, scale)
    p['bridge2'] = make_suft(pg, 2 * F, F, scale)
    p['bridge3'] = make_suft(pg, 3 * F, F, scale)
    p['tail'] = [make_rg(pg, 4 * F, K, 8), make_rg(pg, 4 * F, K, 8)]
    p['upsampler'] = make_dense_proj(pg, 4 * F, 4 * F, scale)
    p['last1'] = make_conv(pg, 4 * F, F, 3)
    p['last2'] = make_conv(pg, F, 1, 3)
    return p


def ffdg_forward(params, x, K=3):
    image_nchw, depth_nchw = x
    img = jnp.transpose(image_nchw, (0, 2, 3, 1)).astype(jnp.float32)
    dp = jnp.transpose(depth_nchw, (0, 2, 3, 1)).astype(jnp.float32)

    # depth branch
    dp_in = conv2d(dp, params['conv_dp1'], padding=1, act='lrelu')
    dp1 = residual_group(params['dp_rg1'], dp_in, K)

    # rgb branch
    imgp = jnp.pad(img, ((0, 0), (3, 3), (3, 3), (0, 0)), mode='reflect')
    rgb1_l = conv2d(imgp, params['conv_rgb1'], padding=0, act='relu')
    rgb0_l, rgb0_g = ffc_bn_act(params['rgb_conv1'], rgb1_l, None, act='none')
    f1_l, f1_g = ffc_resnet_block(params['rgb_rb1'], rgb0_l, rgb0_g)
    f2_l, f2_g = ffc_resnet_block(params['rgb_rb12'], f1_l, f1_g)
    f3_l, f3_g = ffc_resnet_block(params['rgb_rb13'], f2_l, f2_g)

    # bridges (ConcatTupleLayer = concat local/global channels)
    ca1_in = suft(params['bridge1'], dp1, jnp.concatenate([f1_l, f1_g], axis=-1))
    dp2 = residual_group(params['dp_rg2'], ca1_in, K)
    ca2_in = suft(params['bridge2'], dp2, jnp.concatenate([f2_l, f2_g], axis=-1))
    dp3 = residual_group(params['dp_rg3'], ca2_in, K)
    ca3_in = suft(params['bridge3'], dp3, jnp.concatenate([f3_l, f3_g], axis=-1))
    dp4 = residual_group(params['dp_rg4'], ca3_in, K)

    # tail
    tail_in = dense_projection(params['upsampler'], dp4)
    t = residual_group(params['tail'][0], tail_in, K)
    t = residual_group(params['tail'][1], t, K)
    y = conv2d(t, params['last1'], padding=1, act='lrelu')
    y = conv2d(y, params['last2'], padding=1)
    return jnp.transpose(y, (0, 3, 1, 2)).astype(jnp.float32)


if __name__ == "__main__":
    F, K, SCALE = 16, 3, 2
    B, h, w = 1, 8, 8
    H, W = h * SCALE, w * SCALE

    key = jax.random.PRNGKey(0)
    k_img, k_dp = jax.random.split(key)
    image = jax.random.normal(k_img, (B, 3, H, W), jnp.float32)   # HR RGB (NCHW)
    depth = jax.random.normal(k_dp, (B, 1, h, w), jnp.float32)    # LR depth (NCHW)

    params = make_params(0, F, K, SCALE)
    out = ffdg_forward(params, (image, depth), K)
    out = jax.block_until_ready(out)

    assert out.shape == (B, 1, H, W), out.shape
    assert bool(jnp.all(jnp.isfinite(out)))
    print("KERNEL_OK")
</pallas_src>

<mosaic_0001>
module attributes {stable_mosaic.version = 11 : i64} {
  func.func @_mm_kernel(%arg0: i32, %arg1: i32, %arg2: i32, %arg3: memref<64x9xbf16, #tpu.memory_space<vmem>>, %arg4: memref<9x16xbf16, #tpu.memory_space<vmem>>, %arg5: memref<1x16xf32, #tpu.memory_space<vmem>>, %arg6: memref<64x16xbf16, #tpu.memory_space<vmem>>) attributes {dimension_semantics = [#tpu.dimension_semantics<parallel>, #tpu.dimension_semantics<parallel>, #tpu.dimension_semantics<arbitrary>], iteration_bounds = array<i64: 1, 1, 1>, scalar_prefetch = 0 : i64, scratch_operands = 0 : i64, tpu.core_type = #tpu.core_type<tc>, window_params = [{transform_indices = @transform_0, window_bounds = array<i64: 64, 9>}, {transform_indices = @transform_1, window_bounds = array<i64: 9, 16>}, {transform_indices = @transform_2, window_bounds = array<i64: 1, 16>}, {transform_indices = @transform_3, window_bounds = array<i64: 64, 16>}]} {
    %c0 = arith.constant 0 : index
    %c0_0 = arith.constant 0 : index
    %0 = vector.load %arg3[%c0, %c0_0] : memref<64x9xbf16, #tpu.memory_space<vmem>>, vector<64x9xbf16>
    %c0_1 = arith.constant 0 : index
    %c0_2 = arith.constant 0 : index
    %1 = vector.load %arg4[%c0_1, %c0_2] : memref<9x16xbf16, #tpu.memory_space<vmem>>, vector<9x16xbf16>
    %cst = arith.constant dense<0.000000e+00> : vector<64x16xf32>
    %2 = tpu.matmul %0, %1, %cst {dimension_numbers = #tpu.dot_dimension_numbers<[1], [0], [0], [1], [0, 0, 1, 1], [], []>} : vector<64x9xbf16>, vector<9x16xbf16>, vector<64x16xf32> -> vector<64x16xf32>
    %c0_3 = arith.constant 0 : index
    %c0_4 = arith.constant 0 : index
    %3 = vector.load %arg5[%c0_3, %c0_4] : memref<1x16xf32, #tpu.memory_space<vmem>>, vector<1x16xf32>
    %4 = vector.broadcast %3 : vector<1x16xf32> to vector<64x16xf32>
    %5 = arith.addf %2, %4 : vector<64x16xf32>
    %cst_5 = arith.constant 0.000000e+00 : f32
    %6 = vector.broadcast %cst_5 : f32 to vector<64x16xf32>
    %7 = arith.cmpf oge, %5, %6 : vector<64x16xf32>
    %cst_6 = arith.constant 2.000000e-01 : f32
    %8 = vector.broadcast %cst_6 : f32 to vector<64x16xf32>
    %9 = arith.mulf %8, %5 : vector<64x16xf32>
    %10 = arith.select %7, %5, %9 : vector<64x16xi1>, vector<64x16xf32>
    %11 = arith.truncf %10 : vector<64x16xf32> to vector<64x16xbf16>
    %c0_7 = arith.constant 0 : index
    %c0_8 = arith.constant 0 : index
    %12 = vector.load %arg6[%c0_7, %c0_8] : memref<64x16xbf16, #tpu.memory_space<vmem>>, vector<64x16xbf16>
    tpu.vector_store %arg6[%c0_7, %c0_8], %11 {strides = array<i32>} : memref<64x16xbf16, #tpu.memory_space<vmem>>, vector<64x16xbf16>,
    return
  }
  func.func @transform_0(%arg0: i32, %arg1: i32, %arg2: i32) -> (i32, i32) {
    %c0_i32 = arith.constant 0 : i32
    return %arg0, %arg2 : i32, i32
  }
  func.func @transform_1(%arg0: i32, %arg1: i32, %arg2: i32) -> (i32, i32) {
    %c0_i32 = arith.constant 0 : i32
    return %arg2, %arg1 : i32, i32
  }
  func.func @transform_2(%arg0: i32, %arg1: i32, %arg2: i32) -> (i32, i32) {
    %c0_i32 = arith.constant 0 : i32
    %c0_i32_0 = arith.constant 0 : i32
    return %c0_i32, %arg1 : i32, i32
  }
  func.func @transform_3(%arg0: i32, %arg1: i32, %arg2: i32) -> (i32, i32) {
    %c0_i32 = arith.constant 0 : i32
    return %arg0, %arg1 : i32, i32
  }
}

</mosaic_0001>

<bundles_post_ra>
// kernel: tpu_custom_call.1
= control target key start
LH: loop header
LB: loop body
LE: loop exit
PB: predicated region body
PF: predicated region fallthrough
CT: control target
= control target key end

     0   :  { %vm67_vm0 = vcmask 1043456   ;;  %vm68_vm1 = vcmask 1044480   ;;  %v182_v2 = vmov 65535   ;;  %vm54_vm2 = vcmask 72704   ;;  %s256_s1 = inlined_call_operand.vmem [shape: bf16[9,16], index: 1, kind: input, shape index: {}]   ;;  %s257_s0 = inlined_call_operand.vmem [shape: bf16[64,9], index: 0, kind: input, shape index: {}]   ;;  %s258_s2 = inlined_call_operand.vmem [shape: f32[1,16], index: 2, kind: input, shape index: {}]   ;;  %s259_s3 = inlined_call_operand.vmem [shape: bf16[64,16], index: 3, kind: output, shape index: {}]  }
   0x1   :  { %v166_v0 = vld [vmem:[%s256_s1] sm:$0xf]  ;;  %v176_v1 = vld [vmem:[%s256_s1] sm:$0x10]  ;;  %v69_v3 = vsel %vm67_vm0, 4294967295, %v182_v2  ;;  %v173_v8 = vld [vmem:[%s257_s0 + $0x8] sm:$0xff] }
   0x2   :  { %v167_v4 = vor.u32 %v176_v1, %v166_v0  ;;  %v70_v5 = vsel %vm68_vm1, %v69_v3, 0  ;;  %v172_v7 = vld [vmem:[%s257_s0] sm:$0xff]  ;;  %v174_v9 = vld [vmem:[%s257_s0 + $0x10] sm:$0xff]  ;;  %v175_v10 = vld [vmem:[%s257_s0 + $0x18] sm:$0xff]  ;;  %vm135_vm5 = vcmask 125952  }
   0x3   :  { %v181_v11 = vld [vmem:[%s258_s2] ss:$0 sm:$0xff] }
   0x4   :  { %v72_v6 = vand.u32 %v167_v4, %v70_v5 }
   0x6   :  { %81 = vmatpush.bf16.msra.mxu0 %v72_v6  ;;  %177 = vmatpush.bf16.msra.mxu1 %v72_v6 }
   0x7   :  { %178 = vmatpush.bf16.msra.mxu2 %v72_v6  ;;  %179 = vmatpush.bf16.msra.mxu3 %v72_v6 }
   0x9   :  { %168 = vmatmul.msk.bf16.vlgmr.msra.gmra.mxu0 %vm54_vm2, %v172_v7  ;;  %169 = vmatmul.msk.bf16.vlgmr.msra.gmra.mxu1 %vm54_vm2, %v173_v8 }
   0xa   :  { %170 = vmatmul.msk.bf16.vlgmr.msra.gmra.mxu2 %vm54_vm2, %v174_v9  ;;  %171 = vmatmul.msk.bf16.vlgmr.msra.gmra.mxu3 %vm54_vm2, %v175_v10 }
  0x86   :  { %v83_v12 = vpop.f32.mrf.mxu0  ;;  %v88_v13 = vpop.f32.mrf.mxu1 }
  0x87   :  { %v84_v14 = vadd.f32 %v181_v11, %v83_v12  ;;  %v89_v15 = vadd.f32 %v181_v11, %v88_v13 }
  0x89   :  { %vm103_vm3 = vcmp.ge.f32.partialorder %v84_v14, 0.0  ;;  %v111_v16 = vmul.f32 0.2, %v84_v14  ;;  %vm105_vm4 = vcmp.ge.f32.partialorder %v89_v15, 0.0  ;;  %v113_v17 = vmul.f32 0.2, %v89_v15 }
  0x8b   :  { %v119_v18 = vsel %vm103_vm3, %v84_v14, %v111_v16  ;;  %v121_v19 = vsel %vm105_vm4, %v89_v15, %v113_v17 }
  0x8c   :  { %v127_v20 = vpack.c.bf16 %v119_v18, %v119_v18  ;;  %v129_v21 = vpack.c.bf16 %v121_v19, %v121_v19 }
  0x8d   :  { %v93_v22 = vpop.f32.mrf.mxu2  ;;  %v98_v23 = vpop.f32.mrf.mxu3 }
  0x8e   :  { %136 = vst.msk [vmem:[%s259_s3] sm:$0xf] %vm135_vm5, %v127_v20  ;;  %v94_v24 = vadd.f32 %v181_v11, %v93_v22  ;;  %v99_v25 = vadd.f32 %v181_v11, %v98_v23  ;;  %v85_v26 = vpop.f32.mrf.mxu0  ;;  %v90_v27 = vpop.f32.mrf.mxu1 }
  0x8f   :  { %138 = vst.msk [vmem:[%s259_s3 + $0x8] sm:$0xf] %vm135_vm5, %v129_v21  ;;  %v86_v28 = vadd.f32 %v181_v11, %v85_v26  ;;  %v91_v29 = vadd.f32 %v181_v11, %v90_v27 }
  0x90   :  { %vm107_vm6 = vcmp.ge.f32.partialorder %v94_v24, 0.0  ;;  %v115_v30 = vmul.f32 0.2, %v94_v24  ;;  %vm109_vm7 = vcmp.ge.f32.partialorder %v99_v25, 0.0  ;;  %v117_v31 = vmul.f32 0.2, %v99_v25 }
  0x91   :  { %vm104_vm8 = vcmp.ge.f32.partialorder %v86_v28, 0.0  ;;  %v112_v32 = vmul.f32 0.2, %v86_v28  ;;  %vm106_vm9 = vcmp.ge.f32.partialorder %v91_v29, 0.0  ;;  %v114_v33 = vmul.f32 0.2, %v91_v29 }
  0x92   :  { %v123_v34 = vsel %vm107_vm6, %v94_v24, %v115_v30  ;;  %v125_v35 = vsel %vm109_vm7, %v99_v25, %v117_v31 }
  0x93   :  { %v131_v36 = vpack.c.bf16 %v123_v34, %v123_v34  ;;  %v133_v37 = vpack.c.bf16 %v125_v35, %v125_v35  ;;  %v120_v38 = vsel %vm104_vm8, %v86_v28, %v112_v32  ;;  %v122_v39 = vsel %vm106_vm9, %v91_v29, %v114_v33 }
  0x94   :  { %v128_v40 = vpack.c.bf16 %v120_v38, %v120_v38  ;;  %v130_v41 = vpack.c.bf16 %v122_v39, %v122_v39 }
  0x95   :  { %140 = vst.msk [vmem:[%s259_s3 + $0x10] sm:$0xf] %vm135_vm5, %v131_v36  ;;  %v95_v42 = vpop.f32.mrf.mxu2  ;;  %v100_v43 = vpop.f32.mrf.mxu3 }
  0x96   :  { %142 = vst.msk [vmem:[%s259_s3 + $0x18] sm:$0xf] %vm135_vm5, %v133_v37  ;;  %v96_v44 = vadd.f32 %v181_v11, %v95_v42  ;;  %v101_v45 = vadd.f32 %v181_v11, %v100_v43 }
  0x97   :  { %137 = vst.msk [vmem:[%s259_s3 + $0x4] sm:$0xf] %vm135_vm5, %v128_v40 }
  0x98   :  { %139 = vst.msk [vmem:[%s259_s3 + $0xc] sm:$0xf] %vm135_vm5, %v130_v41  ;;  %vm108_vm10 = vcmp.ge.f32.partialorder %v96_v44, 0.0  ;;  %v116_v46 = vmul.f32 0.2, %v96_v44  ;;  %vm110_vm11 = vcmp.ge.f32.partialorder %v101_v45, 0.0 }
  0x99   :  { %v118_v47 = vmul.f32 0.2, %v101_v45 }
  0x9a   :  { %v124_v48 = vsel %vm108_vm10, %v96_v44, %v116_v46 }
  0x9b   :  { %v132_v49 = vpack.c.bf16 %v124_v48, %v124_v48  ;;  %v126_v50 = vsel %vm110_vm11, %v101_v45, %v118_v47 }
  0x9c   :  { %v134_v51 = vpack.c.bf16 %v126_v50, %v126_v50 }
  0x9d   :  { %141 = vst.msk [vmem:[%s259_s3 + $0x14] sm:$0xf] %vm135_vm5, %v132_v49 }
  0x9e   :  { %143 = vst.msk [vmem:[%s259_s3 + $0x1c] sm:$0xf] %vm135_vm5, %v134_v51 }

</bundles_post_ra>
